<compile_context>
chip_gen: v6e
topology: v6e:2x2x1
jax: 0.10.0
libtpu: 0.0.40
codegen_flags: <defaults>
</compile_context>

<pallas_src>
import jax
import jax.numpy as jnp
from jax import lax
from jax.experimental import pallas as pl
from jax.experimental.pallas import tpu as pltpu


def fm_kernel(bias_ref, waug_ref, wnum_ref, idx_ref, xaug_ref, out_ref):
    # bias_ref : [1]          f32  SMEM
    # waug_ref : [2K+1, V]    tbl  VMEM (rows 0..K-1 emb^T, K..2K-1 (emb^T)^2, 2K lin^T)
    # wnum_ref : [2K+1, 2Nn]  tbl  VMEM ([W | 0] ; [0 | W^2] ; [lnum | 0])
    # idx_ref  : [Fc, TB]     i32  VMEM (categorical ids, batch on lanes)
    # xaug_ref : [2Nn, TB]    f32  VMEM (rows 0..Nn-1 = x^T, Nn..2Nn-1 = (x^T)^2)
    # out_ref  : [1, TB]      f32  VMEM (lane-dense output)
    twok1, v = waug_ref.shape
    k = (twok1 - 1) // 2
    fc, tb = idx_ref.shape

    # ---- fused categorical lookup: multi-hot counts over the vocabulary ----
    idx = idx_ref[...]                                        # [Fc, TB] i32
    iota_v = lax.broadcasted_iota(jnp.int32, (v, 1), 0)       # [V, 1] (lane-broadcast)
    cnt = jnp.zeros((v, tb), jnp.float32)
    for f in range(fc):                                       # Fc is small / static
        cnt = cnt + (iota_v == idx[f:f + 1, :]).astype(jnp.float32)

    waug = waug_ref[...]                                      # [2K+1, V]
    wnum = wnum_ref[...]                                      # [2K+1, 2Nn]
    # single MXU pass over the counts gives sum_f(e), sum_f(e^2) and sum_f(lin_w)
    a = jnp.dot(waug, cnt.astype(waug.dtype),
                preferred_element_type=jnp.float32)           # [2K+1, TB]
    # tiny (2Nn-deep) contraction folds the numerical fields into the same rows
    a = a + jnp.dot(wnum, xaug_ref[...].astype(wnum.dtype),
                    preferred_element_type=jnp.float32)       # [2K+1, TB]

    s1 = a[:k, :]                                             # sum_f e       [K, TB]
    s2 = a[k:2 * k, :]                                        # sum_f e^2     [K, TB]
    lin = a[2 * k:, :]                                        # linear term   [1, TB]

    # ---- FM interaction (linear-time identity, VPU/XLU) + linear + bias ----
    inter = 0.5 * jnp.sum(s1 * s1 - s2, axis=0, keepdims=True)  # [1, TB]
    out_ref[...] = inter + lin + bias_ref[0]


def fm_pallas(cat_features, num_features, params, *, tb=512,
              table_dtype=jnp.float32):
    """Forward pass of FM. Returns [B, 1] float32.

    tb: batch tile (lane) width, multiple of 128 (default 512; clamped for
        tiny batches).  For v7x prefer a tb giving >= 2 grid steps so the
        'parallel' batch axis can be sharded across both TensorCores.
    table_dtype: optionally jnp.bfloat16 on v6e/v7x to use the native bf16
        MXU path for large vocabularies (changes numerics ~1e-2 relative);
        default f32 keeps exact parity with the reference.
    """
    cat_emb, cat_lin, num_emb, num_lin, bias = params
    B, fc = cat_features.shape
    v, k = cat_emb.shape

    if num_features is None:
        # zero numerical field: mathematically a no-op, keeps one code path
        num_features = jnp.zeros((B, 1), jnp.float32)
        num_emb = jnp.zeros((k, 1), jnp.float32)
        num_lin = jnp.zeros((1, 1), jnp.float32)
    nn = num_features.shape[1]

    # ---- tile sizing: big tiles amortize per-step overhead, clamp for tiny B
    bp128 = pl.cdiv(B, 128) * 128
    tb = max(128, min((tb // 128) * 128, bp128))
    bp = pl.cdiv(B, tb) * tb

    # ---- batch on the lane axis, padded to a multiple of the tile width ----
    cat_t = jnp.pad(cat_features.astype(jnp.int32).T, ((0, 0), (0, bp - B)))
    x_t = num_features.astype(jnp.float32).T                      # [Nn, B]
    xaug = jnp.concatenate([x_t, x_t * x_t], axis=0)              # [2Nn, B]
    xaug = jnp.pad(xaug, ((0, 0), (0, bp - B)))                   # [2Nn, bp]

    # ---- constant stacked weight blocks (built once, outside the grid) ----
    emb_t = cat_emb.astype(jnp.float32).T                         # [K, V]
    waug2 = jnp.concatenate(
        [emb_t, emb_t * emb_t, cat_lin.astype(jnp.float32).T],
        axis=0).astype(table_dtype)                               # [2K+1, V]

    w = num_emb.astype(jnp.float32)                               # [K, Nn]
    lnum = num_lin.astype(jnp.float32)                            # [1, Nn]
    zkn = jnp.zeros((k, nn), jnp.float32)
    wnum_aug = jnp.concatenate([
        jnp.concatenate([w, zkn], axis=1),                        # [W   | 0  ]
        jnp.concatenate([zkn, w * w], axis=1),                    # [0   | W^2]
        jnp.concatenate([lnum, jnp.zeros((1, nn), jnp.float32)], axis=1),
    ], axis=0).astype(table_dtype)                                # [2K+1, 2Nn]

    out = pl.pallas_call(
        fm_kernel,
        out_shape=jax.ShapeDtypeStruct((1, bp), jnp.float32),
        grid_spec=pltpu.PrefetchScalarGridSpec(
            num_scalar_prefetch=0,
            grid=(bp // tb,),
            in_specs=[
                pl.BlockSpec(memory_space=pltpu.MemorySpace.SMEM),   # bias
                pl.BlockSpec((2 * k + 1, v), lambda i: (0, 0)),      # waug2 (resident)
                pl.BlockSpec((2 * k + 1, 2 * nn), lambda i: (0, 0)), # wnum_aug (resident)
                pl.BlockSpec((fc, tb), lambda i: (0, i)),            # cat ids tile
                pl.BlockSpec((2 * nn, tb), lambda i: (0, i)),        # [x; x^2] tile
            ],
            out_specs=pl.BlockSpec((1, tb), lambda i: (0, i)),       # lane-dense out
        ),
        compiler_params=pltpu.CompilerParams(
            dimension_semantics=("parallel",),
            vmem_limit_bytes=32 * 1024 * 1024),
    )(bias, waug2, wnum_aug, cat_t, xaug)

    return out[0, :B].reshape(B, 1)


# --------------------------------------------------------------------------
# Parameter construction + pure-JAX reference (mirrors the PyTorch module)
# --------------------------------------------------------------------------
def init_params(key, num_embeddings, num_numerical, k):
    k1, k2, k3, k4 = jax.random.split(key, 4)
    cat_emb = jax.random.normal(k1, (num_embeddings, k), jnp.float32)   # N(0,1)
    cat_lin = jax.random.normal(k2, (num_embeddings, 1), jnp.float32)
    b_emb = (6.0 / (k + num_numerical)) ** 0.5                          # xavier_uniform
    num_emb = jax.random.uniform(k3, (k, num_numerical), jnp.float32, -b_emb, b_emb)
    b_lin = (6.0 / (1 + num_numerical)) ** 0.5
    num_lin = jax.random.uniform(k4, (1, num_numerical), jnp.float32, -b_lin, b_lin)
    bias = jnp.zeros((1,), jnp.float32)
    return cat_emb, cat_lin, num_emb, num_lin, bias


def fm_reference(params, cat_features, num_features):
    cat_emb, cat_lin, num_emb, num_lin, bias = params
    embds = cat_emb[cat_features]                                       # [B,Fc,K]
    linw = cat_lin[cat_features]                                        # [B,Fc,1]
    if num_features is not None:
        embds = jnp.concatenate(
            [embds, jnp.einsum('ik,jk->ikj', num_features, num_emb)], axis=1)
        linw = jnp.concatenate(
            [linw, jnp.einsum('ik,jk->ikj', num_features, num_lin)], axis=1)
    sum_of_square = jnp.sum(embds ** 2, axis=1)
    square_of_sum = jnp.sum(embds, axis=1) ** 2
    interactions = 0.5 * jnp.sum(square_of_sum - sum_of_square, axis=1, keepdims=True)
    linear = jnp.sum(linw, axis=1) + bias                               # [B,1]
    return interactions + linear


if __name__ == "__main__":
    key = jax.random.PRNGKey(0)
    categorical_dims = (3, 5, 4, 2)          # 4 categorical fields
    num_numerical = 3
    k = 32
    B = 8
    num_embeddings = sum(categorical_dims) + 1   # 15

    pkey, ckey, nkey = jax.random.split(key, 3)
    params = init_params(pkey, num_embeddings, num_numerical, k)

    cat_features = jax.random.randint(
        ckey, (B, len(categorical_dims)), 0, num_embeddings, dtype=jnp.int32)
    num_features = jax.random.normal(nkey, (B, num_numerical), jnp.float32)

    out = fm_pallas(cat_features, num_features, params)
    out = jax.block_until_ready(out)

    ref = fm_reference(params, cat_features, num_features)
    assert out.shape == (B, 1)
    assert jnp.allclose(out, ref, atol=1e-3, rtol=1e-3), (out, ref)
    print("KERNEL_OK")
</pallas_src>

<mosaic_0001>
module attributes {stable_mosaic.version = 11 : i64} {
  func.func @fm_kernel(%arg0: i32, %arg1: memref<1xf32, #tpu.memory_space<smem>>, %arg2: memref<65x15xf32, #tpu.memory_space<vmem>>, %arg3: memref<65x6xf32, #tpu.memory_space<vmem>>, %arg4: memref<4x128xi32, #tpu.memory_space<vmem>>, %arg5: memref<6x128xf32, #tpu.memory_space<vmem>>, %arg6: memref<1x128xf32, #tpu.memory_space<vmem>>) attributes {dimension_semantics = [#tpu.dimension_semantics<parallel>], iteration_bounds = array<i64: 1>, scalar_prefetch = 0 : i64, scratch_operands = 0 : i64, tpu.core_type = #tpu.core_type<tc>, window_params = [{transform_indices = @transform_0, window_bounds = array<i64: 1>}, {pipeline_mode = #tpu.pipeline_mode<synchronous>, transform_indices = @transform_1, window_bounds = array<i64: 65, 15>}, {pipeline_mode = #tpu.pipeline_mode<synchronous>, transform_indices = @transform_2, window_bounds = array<i64: 65, 6>}, {transform_indices = @transform_3, window_bounds = array<i64: 4, 128>}, {transform_indices = @transform_4, window_bounds = array<i64: 6, 128>}, {transform_indices = @transform_5, window_bounds = array<i64: 1, 128>}]} {
    %c0 = arith.constant 0 : index
    %c0_0 = arith.constant 0 : index
    %0 = vector.load %arg4[%c0, %c0_0] : memref<4x128xi32, #tpu.memory_space<vmem>>, vector<4x128xi32>
    %1 = tpu.iota {dimensions = array<i32: 0>} : vector<15x1xi32>
    %cst = arith.constant 0.000000e+00 : f32
    %2 = vector.broadcast %cst : f32 to vector<15x128xf32>
    %3 = vector.extract_strided_slice %0 {offsets = [0, 0], sizes = [1, 128], strides = [1, 1]} : vector<4x128xi32> to vector<1x128xi32>
    %4 = vector.broadcast %1 : vector<15x1xi32> to vector<15x128xi32>
    %5 = vector.broadcast %3 : vector<1x128xi32> to vector<15x128xi32>
    %6 = arith.cmpi eq, %4, %5 : vector<15x128xi32>
    %7 = arith.extui %6 : vector<15x128xi1> to vector<15x128xi32>
    %8 = arith.sitofp %7 : vector<15x128xi32> to vector<15x128xf32>
    %9 = arith.addf %2, %8 : vector<15x128xf32>
    %10 = vector.extract_strided_slice %0 {offsets = [1, 0], sizes = [1, 128], strides = [1, 1]} : vector<4x128xi32> to vector<1x128xi32>
    %11 = vector.broadcast %1 : vector<15x1xi32> to vector<15x128xi32>
    %12 = vector.broadcast %10 : vector<1x128xi32> to vector<15x128xi32>
    %13 = arith.cmpi eq, %11, %12 : vector<15x128xi32>
    %14 = arith.extui %13 : vector<15x128xi1> to vector<15x128xi32>
    %15 = arith.sitofp %14 : vector<15x128xi32> to vector<15x128xf32>
    %16 = arith.addf %9, %15 : vector<15x128xf32>
    %17 = vector.extract_strided_slice %0 {offsets = [2, 0], sizes = [1, 128], strides = [1, 1]} : vector<4x128xi32> to vector<1x128xi32>
    %18 = vector.broadcast %1 : vector<15x1xi32> to vector<15x128xi32>
    %19 = vector.broadcast %17 : vector<1x128xi32> to vector<15x128xi32>
    %20 = arith.cmpi eq, %18, %19 : vector<15x128xi32>
    %21 = arith.extui %20 : vector<15x128xi1> to vector<15x128xi32>
    %22 = arith.sitofp %21 : vector<15x128xi32> to vector<15x128xf32>
    %23 = arith.addf %16, %22 : vector<15x128xf32>
    %24 = vector.extract_strided_slice %0 {offsets = [3, 0], sizes = [1, 128], strides = [1, 1]} : vector<4x128xi32> to vector<1x128xi32>
    %25 = vector.broadcast %1 : vector<15x1xi32> to vector<15x128xi32>
    %26 = vector.broadcast %24 : vector<1x128xi32> to vector<15x128xi32>
    %27 = arith.cmpi eq, %25, %26 : vector<15x128xi32>
    %28 = arith.extui %27 : vector<15x128xi1> to vector<15x128xi32>
    %29 = arith.sitofp %28 : vector<15x128xi32> to vector<15x128xf32>
    %30 = arith.addf %23, %29 : vector<15x128xf32>
    %c0_1 = arith.constant 0 : index
    %c0_2 = arith.constant 0 : index
    %31 = vector.load %arg2[%c0_1, %c0_2] : memref<65x15xf32, #tpu.memory_space<vmem>>, vector<65x15xf32>
    %c0_3 = arith.constant 0 : index
    %c0_4 = arith.constant 0 : index
    %32 = vector.load %arg3[%c0_3, %c0_4] : memref<65x6xf32, #tpu.memory_space<vmem>>, vector<65x6xf32>
    %cst_5 = arith.constant dense<0.000000e+00> : vector<65x128xf32>
    %33 = tpu.matmul %31, %30, %cst_5 {dimension_numbers = #tpu.dot_dimension_numbers<[1], [0], [0], [1], [0, 0, 1, 1], [], []>} : vector<65x15xf32>, vector<15x128xf32>, vector<65x128xf32> -> vector<65x128xf32>
    %c0_6 = arith.constant 0 : index
    %c0_7 = arith.constant 0 : index
    %34 = vector.load %arg5[%c0_6, %c0_7] : memref<6x128xf32, #tpu.memory_space<vmem>>, vector<6x128xf32>
    %cst_8 = arith.constant dense<0.000000e+00> : vector<65x128xf32>
    %35 = tpu.matmul %32, %34, %cst_8 {dimension_numbers = #tpu.dot_dimension_numbers<[1], [0], [0], [1], [0, 0, 1, 1], [], []>} : vector<65x6xf32>, vector<6x128xf32>, vector<65x128xf32> -> vector<65x128xf32>
    %36 = arith.addf %33, %35 : vector<65x128xf32>
    %37 = vector.extract_strided_slice %36 {offsets = [0, 0], sizes = [32, 128], strides = [1, 1]} : vector<65x128xf32> to vector<32x128xf32>
    %38 = vector.extract_strided_slice %36 {offsets = [32, 0], sizes = [32, 128], strides = [1, 1]} : vector<65x128xf32> to vector<32x128xf32>
    %39 = vector.extract_strided_slice %36 {offsets = [64, 0], sizes = [1, 128], strides = [1, 1]} : vector<65x128xf32> to vector<1x128xf32>
    %40 = arith.mulf %37, %37 : vector<32x128xf32>
    %41 = arith.subf %40, %38 : vector<32x128xf32>
    %cst_9 = arith.constant dense<0.000000e+00> : vector<128xf32>
    %42 = vector.multi_reduction <add>, %41, %cst_9 [0] : vector<32x128xf32> to vector<128xf32>
    %43 = vector.shape_cast %42 : vector<128xf32> to vector<1x128xf32>
    %cst_10 = arith.constant 5.000000e-01 : f32
    %44 = vector.broadcast %cst_10 : f32 to vector<1x128xf32>
    %45 = arith.mulf %44, %43 : vector<1x128xf32>
    %46 = arith.addf %45, %39 : vector<1x128xf32>
    %c0_11 = arith.constant 0 : index
    %47 = memref.load %arg1[%c0_11] : memref<1xf32, #tpu.memory_space<smem>>
    %48 = vector.broadcast %47 : f32 to vector<1x128xf32>
    %49 = arith.addf %46, %48 : vector<1x128xf32>
    %c0_12 = arith.constant 0 : index
    %c0_13 = arith.constant 0 : index
    %50 = vector.load %arg6[%c0_12, %c0_13] : memref<1x128xf32, #tpu.memory_space<vmem>>, vector<1x128xf32>
    tpu.vector_store %arg6[%c0_12, %c0_13], %49 {strides = array<i32>} : memref<1x128xf32, #tpu.memory_space<vmem>>, vector<1x128xf32>,
    return
  }
  func.func @transform_0(%arg0: i32) -> i32 {
    %c0_i32 = arith.constant 0 : i32
    %c0_i32_0 = arith.constant 0 : i32
    return %c0_i32 : i32
  }
  func.func @transform_1(%arg0: i32) -> (i32, i32) {
    %c0_i32 = arith.constant 0 : i32
    %c0_i32_0 = arith.constant 0 : i32
    %c0_i32_1 = arith.constant 0 : i32
    return %c0_i32, %c0_i32_0 : i32, i32
  }
  func.func @transform_2(%arg0: i32) -> (i32, i32) {
    %c0_i32 = arith.constant 0 : i32
    %c0_i32_0 = arith.constant 0 : i32
    %c0_i32_1 = arith.constant 0 : i32
    return %c0_i32, %c0_i32_0 : i32, i32
  }
  func.func @transform_3(%arg0: i32) -> (i32, i32) {
    %c0_i32 = arith.constant 0 : i32
    %c0_i32_0 = arith.constant 0 : i32
    return %c0_i32, %arg0 : i32, i32
  }
  func.func @transform_4(%arg0: i32) -> (i32, i32) {
    %c0_i32 = arith.constant 0 : i32
    %c0_i32_0 = arith.constant 0 : i32
    return %c0_i32, %arg0 : i32, i32
  }
  func.func @transform_5(%arg0: i32) -> (i32, i32) {
    %c0_i32 = arith.constant 0 : i32
    %c0_i32_0 = arith.constant 0 : i32
    return %c0_i32, %arg0 : i32, i32
  }
}

</mosaic_0001>

<bundles_post_ra>
// kernel: tpu_custom_call.1
= control target key start
LH: loop header
LB: loop body
LE: loop exit
PB: predicated region body
PF: predicated region fallthrough
CT: control target
= control target key end

     0   :  { %vm121_vm0 = vcmask 1045504   ;;  %v23_v1 = vlaneseq  ;;  %v548_v3 = vmov 0.0   ;;  %vm93_vm1 = vcmask 48128   ;;  %s712_s0 = inlined_call_operand.<no memory space> [shape: f32[1], index: 0, kind: input, shape index: {}]   ;;  %s713_s1 = inlined_call_operand.vmem [shape: f32[65,15], index: 1, kind: input, shape index: {}]   ;;  %s714_s2 = inlined_call_operand.vmem [shape: f32[65,6], index: 2, kind: input, shape index: {}]   ;;  %s715_s3 = inlined_call_operand.vmem [shape: s32[4,128], index: 3, kind: input, shape index: {}]   ;;  %s716_s4 = inlined_call_operand.vmem [shape: f32[6,128], index: 4, kind: input, shape index: {}]   ;;  %s717_s5 = inlined_call_operand.hbm [shape: f32[1,128], index: 5, kind: output, shape index: {}]  }
   0x1   :  { %v92_v0 = vld [vmem:[%s716_s4] sm:$0x3f]  ;;  %463 = vmatprep.subr.mxu0 %v548_v3  ;;  %492 = vmatprep.subr.mxu1 %v548_v3  ;;  %vm549_vm2 = vmmov 0   ;;  %v84_v10 = vld [vmem:[%s714_s2 + $0x8] sm:$0xff] }
   0x2   :  { %v83_v2 = vld [vmem:[%s714_s2] sm:$0xff]  ;;  %464 = vmatpush3.msk.msra.mxu0 %vm121_vm0, %v92_v0  ;;  %465 = vmatprep.mubr.msk.f32.mxu0 %vm549_vm2, %v548_v3  ;;  %v24_v4 = vshrl.u32 %v23_v1, 7 }
   0x3   :  { %v22_v5 = vld [vmem:[%s715_s3] sm:$0xf]  ;;  %466 = vmatmul.mubr.msk.f32.vlgmr.msra.gmra.mxu0 %vm93_vm1, %v83_v2  ;;  %496 = vmatprep.mubr.msk.f32.mxu1 %vm549_vm2, %v548_v3 }
   0x4   :  { %v25_v6 = vadd.s32 8, %v24_v4  ;;  %v28_v7 = vsub.s32 0, %v24_v4  ;;  %v40_v8 = vsub.s32 1, %v24_v4  ;;  %v52_v9 = vsub.s32 2, %v24_v4  ;;  %468 = vmatprep.mubr.msk.f32.mxu0 %vm549_vm2, %v548_v3 }
   0x5   :  { %v64_v11 = vsub.s32 3, %v24_v4 }
   0x6   :  { %v29_v12 = vrot.slane %v22_v5, %v28_v7  ;;  %v41_v13 = vrot.slane %v22_v5, %v40_v8  ;;  %v53_v14 = vrot.slane %v22_v5, %v52_v9 }
   0x7   :  { %v65_v15 = vrot.slane %v22_v5, %v64_v11  ;;  %469 = vmatmul.mubr.msk.f32.gmra.mxu0 %vm93_vm1, %v84_v10 }
   0x8   :  { %11 = vsyncpa [#allocation4], 0  ;;  %vm31_vm3 = vcmp.eq.s32.totalorder %v25_v6, %v29_v12  ;;  %vm43_vm4 = vcmp.eq.s32.totalorder %v25_v6, %v41_v13  ;;  %vm55_vm5 = vcmp.eq.s32.totalorder %v25_v6, %v53_v14  ;;  %vm30_vm6 = vcmp.eq.s32.totalorder %v24_v4, %v29_v12  ;;  %471 = vmatprep.mubr.msk.f32.mxu0 %vm549_vm2, %v548_v3  ;;  %v85_v16 = vld [vmem:[%s714_s2 + $0x10] sm:$0xff]  ;;  %v86_v27 = vld [vmem:[%s714_s2 + $0x18] sm:$0xff]  ;;  %s550_s29 = smov [#allocation3]  }
   0x9   :  { %v415_v17 = vsel %vm31_vm3, 1.0, %v548_v3  ;;  %v417_v18 = vsel %vm43_vm4, 1.0, %v548_v3  ;;  %v419_v19 = vsel %vm55_vm5, 1.0, %v548_v3  ;;  %vm67_vm7 = vcmp.eq.s32.totalorder %v25_v6, %v65_v15  ;;  %v74_v32 = vld [vmem:[%s713_s1] sm:$0xff]  ;;  %v75_v34 = vld [vmem:[%s713_s1 + $0x8] sm:$0xff]  ;;  %v76_v36 = vld [vmem:[%s713_s1 + $0x10] sm:$0xff] }
   0xa   :  { %v49_v20 = vadd.f32 %v417_v18, %v415_v17  ;;  %v414_v21 = vsel %vm30_vm6, 1.0, %v548_v3  ;;  %vm42_vm8 = vcmp.eq.s32.totalorder %v24_v4, %v41_v13  ;;  %v421_v22 = vsel %vm67_vm7, 1.0, %v548_v3  ;;  %v87_v33 = vld [vmem:[%s714_s2 + $0x20] sm:$0xff]  ;;  %v88_v35 = vld [vmem:[%s714_s2 + $0x28] sm:$0xff]  ;;  %v89_v37 = vld [vmem:[%s714_s2 + $0x30] sm:$0xff]  ;;  %s406_s30 = sshll.u32 %s550_s29, 4  ;;  %s407_s30 = int_to_ptr.vmem [resolvable:$true] %s406_s30 }
   0xb   :  { %v416_v23 = vsel %vm42_vm8, 1.0, %v548_v3  ;;  %vm54_vm9 = vcmp.eq.s32.totalorder %v24_v4, %v53_v14  ;;  %vm66_vm10 = vcmp.eq.s32.totalorder %v24_v4, %v65_v15  ;;  %472 = vmatmul.mubr.msk.f32.gmra.mxu0 %vm93_vm1, %v85_v16  ;;  %vm263_vm11 = vcmask 1046528   ;;  %v77_v38 = vld [vmem:[%s713_s1 + $0x18] sm:$0xff]  ;;  %v78_v40 = vld [vmem:[%s713_s1 + $0x20] sm:$0xff]  ;;  %v79_v42 = vld [vmem:[%s713_s1 + $0x28] sm:$0xff]  ;;  %s526_s6 = scalar_lea.vmem %s407_s30, 16  ;;  %p531_p1 = scmp.lt.s32.totalorder %s407_s30, %s407_s30 }
   0xc   :  { %v61_v24 = vadd.f32 %v419_v19, %v49_v20  ;;  %v48_v25 = vadd.f32 %v416_v23, %v414_v21  ;;  %v418_v26 = vsel %vm54_vm9, 1.0, %v548_v3  ;;  %474 = vmatprep.mubr.msk.f32.mxu0 %vm549_vm2, %v548_v3  ;;  %v420_v28 = vsel %vm66_vm10, 1.0, %v548_v3  ;;  %v90_v39 = vld [vmem:[%s714_s2 + $0x38] sm:$0xff]  ;;  %v91_v41 = vld [vmem:[%s714_s2 + $0x40] sm:$0x1]  ;;  %v80_v43 = vld [vmem:[%s713_s1 + $0x30] sm:$0xff]  ;;  %p527_p0 = scmp.ne.s32.totalorder %s407_s30, %s526_s6 }
   0xd   :  { %vm235_vm12 = vcmask 121856   ;;  %v81_v44 = vld [vmem:[%s713_s1 + $0x38] sm:$0xff]  ;;  %v82_v45 = vld [vmem:[%s713_s1 + $0x40] sm:$0x1]  ;;  %s530_s7 = scalar_lea.vmem %s407_s30, 32 }
   0xe   :  { %v73_v29 = vadd.f32 %v421_v22, %v61_v24  ;;  %v60_v30 = vadd.f32 %v418_v26, %v48_v25  ;;  %p532_p2 = scmp.lt.s32.totalorder %s530_s7, %s526_s6 }
   0xf   :  { %475 = vmatmul.mubr.msk.f32.gmra.mxu0 %vm93_vm1, %v86_v27 }
  0x10   :  { %493 = vmatpush3.msk.msra.mxu1 %vm263_vm11, %v73_v29  ;;  %v72_v31 = vadd.f32 %v420_v28, %v60_v30  ;;  %477 = vmatprep.mubr.msk.f32.mxu0 %vm549_vm2, %v548_v3  ;;  %p533_p3 = por %p532_p2, %p531_p1 }
  0x11   :  { %494 = vmatprep.subr.mxu1 %v548_v3 }
  0x12   :  { %495 = vmatpush3.msra.mxu1 %v72_v31  ;;  %p534_p4 = pnand %p533_p3, %p527_p0 }
  0x13   :  { %497 = vmatmul.mubr.msk.f32.vlgmr.msra.gmra.mxu1 %vm235_vm12, %v74_v32  ;;  %478 = vmatmul.mubr.msk.f32.gmra.mxu0 %vm93_vm1, %v87_v33 }
  0x14   :  { %499 = vmatprep.mubr.msk.f32.mxu1 %vm549_vm2, %v548_v3  ;;  %480 = vmatprep.mubr.msk.f32.mxu0 %vm549_vm2, %v548_v3 }
  0x17   :  { %500 = vmatmul.mubr.msk.f32.gmra.mxu1 %vm235_vm12, %v75_v34  ;;  %481 = vmatmul.mubr.msk.f32.gmra.mxu0 %vm93_vm1, %v88_v35 }
  0x18   :  { %502 = vmatprep.mubr.msk.f32.mxu1 %vm549_vm2, %v548_v3  ;;  %483 = vmatprep.mubr.msk.f32.mxu0 %vm549_vm2, %v548_v3 }
  0x1b   :  { %503 = vmatmul.mubr.msk.f32.gmra.mxu1 %vm235_vm12, %v76_v36  ;;  %484 = vmatmul.mubr.msk.f32.gmra.mxu0 %vm93_vm1, %v89_v37 }
  0x1c   :  { %505 = vmatprep.mubr.msk.f32.mxu1 %vm549_vm2, %v548_v3  ;;  %486 = vmatprep.mubr.msk.f32.mxu0 %vm549_vm2, %v548_v3 }
  0x1f   :  { %506 = vmatmul.mubr.msk.f32.gmra.mxu1 %vm235_vm12, %v77_v38  ;;  %487 = vmatmul.mubr.msk.f32.gmra.mxu0 %vm93_vm1, %v90_v39 }
  0x20   :  { %508 = vmatprep.mubr.msk.f32.mxu1 %vm549_vm2, %v548_v3  ;;  %489 = vmatprep.mubr.msk.f32.mxu0 %vm549_vm2, %v548_v3 }
  0x23   :  { %509 = vmatmul.mubr.msk.f32.gmra.mxu1 %vm235_vm12, %v78_v40  ;;  %490 = vmatmul.mubr.msk.f32.gmra.mxu0 %vm93_vm1, %v91_v41 }
  0x24   :  { %511 = vmatprep.mubr.msk.f32.mxu1 %vm549_vm2, %v548_v3 }
  0x27   :  { %512 = vmatmul.mubr.msk.f32.gmra.mxu1 %vm235_vm12, %v79_v42 }
  0x28   :  { %514 = vmatprep.mubr.msk.f32.mxu1 %vm549_vm2, %v548_v3 }
  0x2b   :  { %515 = vmatmul.mubr.msk.f32.gmra.mxu1 %vm235_vm12, %v80_v43 }
  0x2c   :  { %517 = vmatprep.mubr.msk.f32.mxu1 %vm549_vm2, %v548_v3 }
  0x2f   :  { %518 = vmatmul.mubr.msk.f32.gmra.mxu1 %vm235_vm12, %v81_v44 }
  0x30   :  { %520 = vmatprep.mubr.msk.f32.mxu1 %vm549_vm2, %v548_v3 }
  0x33   :  { %521 = vmatmul.mubr.msk.f32.gmra.mxu1 %vm235_vm12, %v82_v45  ;;  %v397_v45 = vstv %s712_s0 }
  0xc3   :  { %v191_v46 = vpop.f32.mrf.mxu0 }
  0xc5   :  { %v467_v47 = vpop.f32.mrf.mxu0 }
  0xc7   :  { %v196_v48 = vpop.f32.mrf.mxu0 }
  0xc9   :  { %v470_v49 = vpop.f32.mrf.mxu0 }
  0xcb   :  { %v201_v50 = vpop.f32.mrf.mxu0 }
  0xcd   :  { %v473_v51 = vpop.f32.mrf.mxu0 }
  0xcf   :  { %v206_v52 = vpop.f32.mrf.mxu0 }
  0xd1   :  { %v476_v53 = vpop.f32.mrf.mxu0 }
  0xd3   :  { %v333_v54 = vpop.f32.mrf.mxu1  ;;  %v211_v55 = vpop.f32.mrf.mxu0 }
  0xd4   :  { %v334_v11 = vadd.f32 %v333_v54, %v191_v46 }
  0xd5   :  { %v498_v56 = vpop.f32.mrf.mxu1  ;;  %v479_v57 = vpop.f32.mrf.mxu0 }
  0xd6   :  { %v377_v18 = vmul.f32 %v334_v11, %v334_v11 }
  0xd7   :  { %v338_v58 = vpop.f32.mrf.mxu1  ;;  %v216_v59 = vpop.f32.mrf.mxu0 }
  0xd8   :  { %v339_v10 = vadd.f32 %v338_v58, %v196_v48 }
  0xd9   :  { %v501_v60 = vpop.f32.mrf.mxu1  ;;  %v482_v61 = vpop.f32.mrf.mxu0 }
  0xda   :  { %v378_v16 = vmul.f32 %v339_v10, %v339_v10 }
  0xdb   :  { %v343_v62 = vpop.f32.mrf.mxu1  ;;  %v221_v63 = vpop.f32.mrf.mxu0 }
  0xdc   :  { %v344_v13 = vadd.f32 %v343_v62, %v201_v50 }
  0xdd   :  { %v504_v0 = vpop.f32.mrf.mxu1  ;;  %v485_v1 = vpop.f32.mrf.mxu0 }
  0xde   :  { %v379_v20 = vmul.f32 %v344_v13, %v344_v13 }
  0xdf   :  { %v348_v2 = vpop.f32.mrf.mxu1  ;;  %v226_v3 = vpop.f32.mrf.mxu0 }
  0xe0   :  { %v349_v21 = vadd.f32 %v348_v2, %v206_v52 }
  0xe1   :  { %v507_v4 = vpop.f32.mrf.mxu1  ;;  %v488_v5 = vpop.f32.mrf.mxu0 }
  0xe2   :  { %v380_v28 = vmul.f32 %v349_v21, %v349_v21 }
  0xe3   :  { %v353_v6 = vpop.f32.mrf.mxu1  ;;  %v231_v7 = vpop.f32.mrf.mxu0 }
  0xe4   :  { %v354_v17 = vadd.f32 %v353_v6, %v211_v55 }
  0xe5   :  { %v510_v8 = vpop.f32.mrf.mxu1  ;;  %v491_v9 = vpop.f32.mrf.mxu0 }
  0xe6   :  { %v381_v25 = vsub.f32 %v377_v18, %v354_v17 }
  0xe7   :  { %v358_v12 = vpop.f32.mrf.mxu1 }
  0xe8   :  { %v359_v14 = vadd.f32 %v358_v12, %v216_v59 }
  0xe9   :  { %v513_v15 = vpop.f32.mrf.mxu1 }
  0xea   :  { %v382_v22 = vsub.f32 %v378_v16, %v359_v14 }
  0xeb   :  { %v363_v19 = vpop.f32.mrf.mxu1 }
  0xec   :  { %v364_v23 = vadd.f32 %v363_v19, %v221_v63  ;;  %v385_v29 = vadd.f32 %v382_v22, %v381_v25 }
  0xed   :  { %v516_v24 = vpop.f32.mrf.mxu1 }
  0xee   :  { %v383_v26 = vsub.f32 %v379_v20, %v364_v23 }
  0xef   :  { %v368_v27 = vpop.f32.mrf.mxu1 }
  0xf0   :  { %v369_v30 = vadd.f32 %v368_v27, %v226_v3  ;;  %v386_v32 = vadd.f32 %v385_v29, %v383_v26 }
  0xf1   :  { %v519_v31 = vpop.f32.mrf.mxu1 }
  0xf2   :  { %v384_v33 = vsub.f32 %v380_v28, %v369_v30 }
  0xf3   :  { %v373_v34 = vpop.f32.mrf.mxu1 }
  0xf4   :  { %v387_v35 = vadd.f32 %v386_v32, %v384_v33  ;;  %v374_v42 = vadd.f32 %v373_v34, %v231_v7 }
  0xf5   :  { %v522_v36 = vpop.f32.mrf.mxu1 }
  0xf6   :  { %v388_v37 = vrot.slane %v387_v35, 4 }
  0xf8   :  { %v389_v38 = vadd.f32 %v388_v37, %v387_v35 }
  0xfa   :  { %v390_v39 = vrot.slane %v389_v38, 2 }
  0xfc   :  { %v391_v40 = vadd.f32 %v390_v39, %v389_v38 }
  0xfe   :  { %v392_v41 = vrot.slane %v391_v40, 1 }
 0x100   :  { %v393_v43 = vadd.f32 %v392_v41, %v391_v40 }
 0x102   :  { %v394_v44 = vmul.f32 0.5, %v393_v43 }
 0x104   :  { %v395_v46 = vadd.f32 %v394_v44, %v374_v42 }
 0x106   :  { %v398_v47 = vadd.f32 %v397_v45, %v395_v46 }
 0x108   :  { %399 = vst [vmem:[#allocation3] sm:$0x1] %v398_v47 }
 0x109   :  { %537 = shalt.err (!%p534_p4)
}
 0x10a   :  { %409 = dma.vmem_to_hbm [thread:$0]  %s407_s30, 16, %s717_s5, [#allocation4]  }
 0x10b   :  { %546 = dma.done.wait [#allocation4], 16  }
 0x10c   :  { %547 = vsyncadd [#allocation4], 4294967280 }
 0x10d   :  { %413 = vsyncpa [#allocation4], 1 }

</bundles_post_ra>
